<compile_context>
chip_gen: v5e
topology: v5e:2x2
jax: 0.10.0
libtpu: 0.0.40
codegen_flags: <defaults>
</compile_context>

<pallas_src>
import functools
import math

import jax
import jax.numpy as jnp
from jax.experimental import pallas as pl
from jax.experimental.pallas import tpu as pltpu

EPS = 1e-5
LANE = 128
VMEM_LIMIT = 32 * 1024 * 1024   # safe scoped-VMEM request on v5e/v6e/v7x


# --------------------------------------------------------------------------
# helpers (host-side parameter plumbing, plain JAX)
# --------------------------------------------------------------------------
def _make_divisible(v, divisor, min_value=None):
    if min_value is None:
        min_value = divisor
    new_v = max(min_value, int(v + divisor / 2) // divisor * divisor)
    if new_v < 0.9 * v:
        new_v += divisor
    return new_v


def _round_up(v, m):
    return ((v + m - 1) // m) * m


def _conv_weight(key, cout, cin_per_group, kh, kw):
    # kaiming_normal_(mode='fan_out'): std = sqrt(2 / (cout * kh * kw))
    fan_out = cout * kh * kw
    std = math.sqrt(2.0 / fan_out)
    return std * jax.random.normal(key, (cout, cin_per_group, kh, kw), jnp.float32)


def _bn_fold(c_store):
    # eval-mode BN with gamma=1, beta=0, running_mean=0, running_var=1.
    # Zero-padded channels get scale~1 / bias 0, which keeps them exactly 0.
    gamma = jnp.ones((c_store,), jnp.float32)
    beta = jnp.zeros((c_store,), jnp.float32)
    rmean = jnp.zeros((c_store,), jnp.float32)
    rvar = jnp.ones((c_store,), jnp.float32)
    scale = gamma / jnp.sqrt(rvar + EPS)
    bias = beta - rmean * scale
    return scale.reshape(1, c_store), bias.reshape(1, c_store)


def _pad_axis(a, axis, size):
    pad = size - a.shape[axis]
    if pad == 0:
        return a
    widths = [(0, 0)] * a.ndim
    widths[axis] = (0, pad)
    return jnp.pad(a, widths)


def _const_spec(a):
    # whole-array block, replicated across the (single-axis) grid
    return pl.BlockSpec(a.shape, lambda n, _nd=a.ndim: (0,) * _nd)


# --------------------------------------------------------------------------
# Pallas kernels
# --------------------------------------------------------------------------
def _mm_bn_relu_kernel(x_ref, w_ref, s_ref, b_ref, o_ref):
    """Row-tiled (TM, K) @ (K, Cout) + BN(scale,bias) + ReLU; bf16 in/out."""
    acc = jnp.dot(x_ref[...], w_ref[...], preferred_element_type=jnp.float32)
    acc = jnp.maximum(acc * s_ref[...] + b_ref[...], 0.0)
    o_ref[...] = acc.astype(o_ref.dtype)


@functools.lru_cache(maxsize=None)
def _fused_block_kernel(H, W, stride, has_expand, has_res, proj_relu, pad_rows):
    """One fused DepthwiseSeparableConv / InvertedResidual block per grid step.

    [pw-expand matmul + BN + ReLU] -> depthwise 3x3 + BN + ReLU (stride 1/2)
    -> pw-project matmul + BN [+ReLU] [+residual].  Hidden stays in VMEM.
    """
    HW = H * W
    Ho = (H - 1) // stride + 1
    Wo = (W - 1) // stride + 1
    HoWo = Ho * Wo

    def kernel(*refs):
        if has_expand:
            (x_ref, wpw_ref, spw_ref, bpw_ref,
             wdw_ref, sdw_ref, bdw_ref,
             wpl_ref, spl_ref, bpl_ref, o_ref, hbuf) = refs
        else:
            (x_ref, wdw_ref, sdw_ref, bdw_ref,
             wpl_ref, spl_ref, bpl_ref, o_ref, hbuf) = refs

        x = x_ref[0]                                            # (HW, Cin) bf16

        # ---- 1x1 expand (MXU, bf16) + BN + ReLU -------------------------------
        if has_expand:
            h = jnp.dot(x, wpw_ref[...], preferred_element_type=jnp.float32)
            h = jnp.maximum(h * spw_ref[...] + bpw_ref[...], 0.0)
        else:
            h = x.astype(jnp.float32)                           # (HW, Chid) f32

        # ---- depthwise 3x3 on flattened rows via zero-padded VMEM scratch -----
        hbuf[...] = jnp.zeros_like(hbuf)
        hbuf[pad_rows:pad_rows + HW, :] = h

        col = jax.lax.broadcasted_iota(jnp.int32, (HW, 1), 0) % W
        mask_l = (col >= 1).astype(jnp.float32)                 # dx = -1 valid
        mask_r = (col <= W - 2).astype(jnp.float32)             # dx = +1 valid

        acc = jnp.zeros_like(h)
        for dy in (-1, 0, 1):
            for dx in (-1, 0, 1):
                k = (dy + 1) * 3 + (dx + 1)
                start = pad_rows + dy * W + dx
                tap = hbuf[start:start + HW, :]                 # (HW, Chid) f32
                contrib = tap * wdw_ref[k:k + 1, :]
                if dx == -1:
                    contrib = contrib * mask_l
                elif dx == 1:
                    contrib = contrib * mask_r
                acc = acc + contrib
        acc = jnp.maximum(acc * sdw_ref[...] + bdw_ref[...], 0.0)
        d = acc.astype(jnp.bfloat16)

        # ---- stride-2: keep even (row, col) positions via 0/1 selection matmul
        if stride == 2:
            q = jax.lax.broadcasted_iota(jnp.int32, (HoWo, HW), 0)
            r = jax.lax.broadcasted_iota(jnp.int32, (HoWo, HW), 1)
            src = 2 * (q // Wo) * W + 2 * (q % Wo)
            sel = (r == src).astype(jnp.bfloat16)
            d = jnp.dot(sel, d, preferred_element_type=jnp.float32)
            d = d.astype(jnp.bfloat16)

        # ---- 1x1 project (MXU, bf16) + BN [+ ReLU] [+ residual] ---------------
        out = jnp.dot(d, wpl_ref[...], preferred_element_type=jnp.float32)
        out = out * spl_ref[...] + bpl_ref[...]
        if proj_relu:
            out = jnp.maximum(out, 0.0)
        if has_res:
            out = out + x.astype(jnp.float32)
        o_ref[0] = out.astype(o_ref.dtype)

    return kernel


def _head_kernel(x_ref, w2_ref, s2_ref, b2_ref, wdw_ref, gs1_ref, gb1_ref,
                 wl_ref, gs2_ref, gb2_ref, o_ref):
    """conv2 (1x1 + BN + ReLU) fused with the GDC head (global depthwise conv
    + BN2d + Linear + BN1d), one image per grid step."""
    x = x_ref[0]                                                # (S2, Cin) bf16
    h = jnp.dot(x, w2_ref[...], preferred_element_type=jnp.float32)
    h = jnp.maximum(h * s2_ref[...] + b2_ref[...], 0.0)         # (S2, C)
    feat = jnp.sum(h * wdw_ref[...], axis=0, keepdims=True)     # (1, C)
    feat = feat * gs1_ref[...] + gb1_ref[...]
    emb = jnp.dot(feat.astype(jnp.bfloat16), wl_ref[...],
                  preferred_element_type=jnp.float32)           # (1, E)
    o_ref[0] = (emb * gs2_ref[...] + gb2_ref[...]).astype(o_ref.dtype)


# --------------------------------------------------------------------------
# kernel wrappers
# --------------------------------------------------------------------------
def matmul_bn_relu(xm, p, tm=256):
    """conv1 matmul: (M, K) @ (K, Cout) + BN + ReLU, tiled + pipelined over rows."""
    M, K = xm.shape
    cout = p['w'].shape[1]
    TM = min(tm, M)
    return pl.pallas_call(
        _mm_bn_relu_kernel,
        grid=(pl.cdiv(M, TM),),
        in_specs=[pl.BlockSpec((TM, K), lambda i: (i, 0)),
                  _const_spec(p['w']), _const_spec(p['s']), _const_spec(p['b'])],
        out_specs=pl.BlockSpec((TM, cout), lambda i: (i, 0)),
        out_shape=jax.ShapeDtypeStruct((M, cout), jnp.bfloat16),
        compiler_params=pltpu.CompilerParams(
            dimension_semantics=("parallel",),
            vmem_limit_bytes=VMEM_LIMIT),
    )(xm, p['w'], p['s'], p['b'])


def fused_block(x, p, *, H, W):
    """x: (N, H*W, Cin_store) bf16 -> (N, Ho*Wo, Cout_store) bf16."""
    N, HW, Cin_s = x.shape
    stride = p['stride']
    Ho = (H - 1) // stride + 1
    Wo = (W - 1) // stride + 1
    has_expand = 'pw_w' in p
    Chid = p['dw_w'].shape[1]
    Cout_s = p['pwl_w'].shape[1]
    pad_rows = _round_up(W + 2, 8)          # aligned interior write offset

    inputs = [x]
    in_specs = [pl.BlockSpec((1, HW, Cin_s), lambda n: (n, 0, 0))]
    names = (['pw_w', 'pw_s', 'pw_b'] if has_expand else []) + \
            ['dw_w', 'dw_s', 'dw_b', 'pwl_w', 'pwl_s', 'pwl_b']
    for nm in names:
        inputs.append(p[nm])
        in_specs.append(_const_spec(p[nm]))

    kernel = _fused_block_kernel(H, W, stride, has_expand,
                                 p['has_res'], p['proj_relu'], pad_rows)
    return pl.pallas_call(
        kernel,
        grid=(N,),
        in_specs=in_specs,
        out_specs=pl.BlockSpec((1, Ho * Wo, Cout_s), lambda n: (n, 0, 0)),
        out_shape=jax.ShapeDtypeStruct((N, Ho * Wo, Cout_s), jnp.bfloat16),
        scratch_shapes=[pltpu.VMEM((2 * pad_rows + HW, Chid), jnp.float32)],
        compiler_params=pltpu.CompilerParams(
            dimension_semantics=("parallel",),
            vmem_limit_bytes=VMEM_LIMIT),
    )(*inputs)


def head_forward(x, p2, pg):
    """x: (N, S2, C) bf16 -> (N, E) f32 embedding (conv2 + GDC fused)."""
    N, S2, C = x.shape
    E = p2['w'].shape[1]
    inputs = [x, p2['w'], p2['s'], p2['b'],
              pg['dw_w'], pg['bn2_s'], pg['bn2_b'],
              pg['lin_w'], pg['bn1d_s'], pg['bn1d_b']]
    in_specs = [pl.BlockSpec((1, S2, C), lambda n: (n, 0, 0))] + \
               [_const_spec(a) for a in inputs[1:]]
    out = pl.pallas_call(
        _head_kernel,
        grid=(N,),
        in_specs=in_specs,
        out_specs=pl.BlockSpec((1, 1, E), lambda n: (n, 0, 0)),
        out_shape=jax.ShapeDtypeStruct((N, 1, E), jnp.float32),
        compiler_params=pltpu.CompilerParams(
            dimension_semantics=("parallel",),
            vmem_limit_bytes=VMEM_LIMIT),
    )(*inputs)
    return out.reshape(N, E)


# --------------------------------------------------------------------------
# model: parameters + forward
# --------------------------------------------------------------------------
def build_mobilefacenet_params(key, width_mult=1.0, round_nearest=8,
                               input_size=32, input_channel=3, last_channel=512):
    setting = [[2, 64, 5, 2], [4, 128, 1, 2], [2, 128, 6, 1],
               [4, 128, 1, 2], [2, 128, 2, 1]]
    first_c = setting[0][1]
    last_channel = _make_divisible(last_channel * max(1.0, width_mult), round_nearest)
    keys = iter(jax.random.split(key, 64))
    params = {}
    spatial = input_size

    # conv1: ConvBNReLU(3, 64, k=3, s=2); cout zero-padded to 128 for lane density
    w = _conv_weight(next(keys), first_c, input_channel, 3, 3)
    wm = jnp.transpose(w, (2, 3, 1, 0)).reshape(9 * input_channel, first_c)
    c_s = _round_up(first_c, LANE)
    s, b = _bn_fold(c_s)
    params['conv1'] = dict(w=_pad_axis(wm, 1, c_s).astype(jnp.bfloat16), s=s, b=b)
    spatial = (spatial - 1) // 2 + 1

    # dw_conv: DepthwiseSeparableConv(64, 64, k=3, p=1)  (no expand, proj has ReLU)
    wdw = _conv_weight(next(keys), first_c, 1, 3, 3).reshape(first_c, 9).T     # (9, 64)
    ds_, db_ = _bn_fold(c_s)
    wpw = _conv_weight(next(keys), first_c, first_c, 1, 1).reshape(first_c, first_c).T
    ps_, pb_ = _bn_fold(c_s)
    params['dw_conv'] = dict(
        dw_w=_pad_axis(wdw, 1, c_s).astype(jnp.float32), dw_s=ds_, dw_b=db_,
        pwl_w=_pad_axis(_pad_axis(wpw, 0, c_s), 1, c_s).astype(jnp.bfloat16),
        pwl_s=ps_, pwl_b=pb_,
        stride=1, has_res=False, proj_relu=True)

    in_c = first_c
    for li, (t, c, n, s_) in enumerate(setting):
        out_c = _make_divisible(c * width_mult, round_nearest)
        blocks = []
        for i in range(n):
            stride = s_ if i == 0 else 1
            hidden = int(round(in_c * t))
            in_s = _round_up(in_c, LANE)
            hid_s = _round_up(hidden, LANE)
            out_s = _round_up(out_c, LANE)

            w_pw = _conv_weight(next(keys), hidden, in_c, 1, 1).reshape(hidden, in_c).T
            pw_s, pw_b = _bn_fold(hid_s)
            w_dw = _conv_weight(next(keys), hidden, 1, 3, 3).reshape(hidden, 9).T
            dw_s, dw_b = _bn_fold(hid_s)
            w_pwl = _conv_weight(next(keys), out_c, hidden, 1, 1).reshape(out_c, hidden).T
            pwl_s, pwl_b = _bn_fold(out_s)

            blocks.append(dict(
                pw_w=_pad_axis(_pad_axis(w_pw, 0, in_s), 1, hid_s).astype(jnp.bfloat16),
                pw_s=pw_s, pw_b=pw_b,
                dw_w=_pad_axis(w_dw, 1, hid_s).astype(jnp.float32),
                dw_s=dw_s, dw_b=dw_b,
                pwl_w=_pad_axis(_pad_axis(w_pwl, 0, hid_s), 1, out_s).astype(jnp.bfloat16),
                pwl_s=pwl_s, pwl_b=pwl_b,
                stride=stride, has_res=(in_c == out_c and stride == 1),
                proj_relu=False))
            in_c = out_c
            spatial = (spatial - 1) // stride + 1
        params['layer%d' % li] = blocks

    # conv2: ConvBNReLU(in_c, last_channel, k=1)
    in_s = _round_up(in_c, LANE)
    lc_s = _round_up(last_channel, LANE)
    w2 = _conv_weight(next(keys), last_channel, in_c, 1, 1).reshape(last_channel, in_c).T
    s2c, b2c = _bn_fold(lc_s)
    params['conv2'] = dict(
        w=_pad_axis(_pad_axis(w2, 0, in_s), 1, lc_s).astype(jnp.bfloat16),
        s=s2c, b=b2c)

    # TODO(synk): the GDC class definition is not in the reference source; this is
    # the standard insightface GDC (global depthwise conv of size feat x feat
    # + BN2d + flatten + Linear(bias=False) + BN1d).
    feat = spatial
    w_gdw = _conv_weight(next(keys), last_channel, 1, feat, feat)     # (C, 1, f, f)
    gs1, gb1 = _bn_fold(lc_s)
    w_lin = 0.01 * jax.random.normal(next(keys), (last_channel, last_channel),
                                     jnp.float32)                     # torch (out, in)
    gs2, gb2 = _bn_fold(lc_s)
    params['output'] = dict(
        dw_w=w_gdw.reshape(last_channel, feat * feat).T.astype(jnp.float32),
        bn2_s=gs1, bn2_b=gb1,
        lin_w=w_lin.T.astype(jnp.bfloat16),
        bn1d_s=gs2, bn1d_b=gb2)
    return params


def mobilefacenet_forward(x_nchw, params):
    # boundary: NCHW (PyTorch) -> NHWC, bf16 activations for the MXU path
    x = jnp.transpose(x_nchw, (0, 2, 3, 1)).astype(jnp.bfloat16)
    N, H, W, Cin = x.shape

    # conv1: 3x3 stride-2 conv + BN + ReLU (im2col in XLA + M-tiled fused matmul)
    # TODO(synk): for production input sizes the Cin=3 im2col should be folded
    # into the kernel; at this size it is a negligible XLA op.
    Ho, Wo = (H - 1) // 2 + 1, (W - 1) // 2 + 1
    xp = jnp.pad(x, ((0, 0), (1, 1), (1, 1), (0, 0)))
    patches = [xp[:, ky:ky + 2 * Ho - 1:2, kx:kx + 2 * Wo - 1:2, :]
               for ky in range(3) for kx in range(3)]
    pat = jnp.concatenate(patches, axis=-1).reshape(N * Ho * Wo, 9 * Cin)
    x = matmul_bn_relu(pat, params['conv1']).reshape(N, Ho * Wo, -1)
    H, W = Ho, Wo

    # dw_conv + all inverted-residual blocks: one fused kernel each
    x = fused_block(x, params['dw_conv'], H=H, W=W)
    for lname in ('layer0', 'layer1', 'layer2', 'layer3', 'layer4'):
        for blk in params[lname]:
            x = fused_block(x, blk, H=H, W=W)
            if blk['stride'] == 2:
                H, W = (H - 1) // 2 + 1, (W - 1) // 2 + 1

    # conv2 (1x1 + BN + ReLU) fused with the GDC head -> (N, 512) embedding
    return head_forward(x, params['conv2'], params['output'])


# --------------------------------------------------------------------------
if __name__ == "__main__":
    key = jax.random.PRNGKey(0)
    pkey, xkey = jax.random.split(key)

    INPUT_SIZE = 32   # small spatial size for the test (PyTorch default is 224)
    params = build_mobilefacenet_params(pkey, input_size=INPUT_SIZE)

    x = jax.random.normal(xkey, (2, 3, INPUT_SIZE, INPUT_SIZE), jnp.float32)
    out = mobilefacenet_forward(x, params)
    out = jax.block_until_ready(out)
    assert out.shape == (2, 512), out.shape
    assert bool(jnp.all(jnp.isfinite(out)))
    print("KERNEL_OK")
</pallas_src>

<mosaic_0001>
module attributes {stable_mosaic.version = 11 : i64} {
  func.func @_mm_bn_relu_kernel(%arg0: i32, %arg1: memref<256x27xbf16, #tpu.memory_space<vmem>>, %arg2: memref<27x128xbf16, #tpu.memory_space<vmem>>, %arg3: memref<1x128xf32, #tpu.memory_space<vmem>>, %arg4: memref<1x128xf32, #tpu.memory_space<vmem>>, %arg5: memref<256x128xbf16, #tpu.memory_space<vmem>>) attributes {dimension_semantics = [#tpu.dimension_semantics<parallel>], iteration_bounds = array<i64: 2>, scalar_prefetch = 0 : i64, scratch_operands = 0 : i64, tpu.core_type = #tpu.core_type<tc>, window_params = [{transform_indices = @transform_0, window_bounds = array<i64: 256, 27>}, {pipeline_mode = #tpu.pipeline_mode<synchronous>, transform_indices = @transform_1, window_bounds = array<i64: 27, 128>}, {pipeline_mode = #tpu.pipeline_mode<synchronous>, transform_indices = @transform_2, window_bounds = array<i64: 1, 128>}, {pipeline_mode = #tpu.pipeline_mode<synchronous>, transform_indices = @transform_3, window_bounds = array<i64: 1, 128>}, {transform_indices = @transform_4, window_bounds = array<i64: 256, 128>}]} {
    %c0 = arith.constant 0 : index
    %c0_0 = arith.constant 0 : index
    %0 = vector.load %arg1[%c0, %c0_0] : memref<256x27xbf16, #tpu.memory_space<vmem>>, vector<256x27xbf16>
    %c0_1 = arith.constant 0 : index
    %c0_2 = arith.constant 0 : index
    %1 = vector.load %arg2[%c0_1, %c0_2] : memref<27x128xbf16, #tpu.memory_space<vmem>>, vector<27x128xbf16>
    %cst = arith.constant dense<0.000000e+00> : vector<256x128xf32>
    %2 = tpu.matmul %0, %1, %cst {dimension_numbers = #tpu.dot_dimension_numbers<[1], [0], [0], [1], [0, 0, 1, 1], [], []>} : vector<256x27xbf16>, vector<27x128xbf16>, vector<256x128xf32> -> vector<256x128xf32>
    %c0_3 = arith.constant 0 : index
    %c0_4 = arith.constant 0 : index
    %3 = vector.load %arg3[%c0_3, %c0_4] : memref<1x128xf32, #tpu.memory_space<vmem>>, vector<1x128xf32>
    %4 = vector.broadcast %3 : vector<1x128xf32> to vector<256x128xf32>
    %5 = arith.mulf %2, %4 : vector<256x128xf32>
    %c0_5 = arith.constant 0 : index
    %c0_6 = arith.constant 0 : index
    %6 = vector.load %arg4[%c0_5, %c0_6] : memref<1x128xf32, #tpu.memory_space<vmem>>, vector<1x128xf32>
    %7 = vector.broadcast %6 : vector<1x128xf32> to vector<256x128xf32>
    %8 = arith.addf %5, %7 : vector<256x128xf32>
    %cst_7 = arith.constant 0.000000e+00 : f32
    %9 = vector.broadcast %cst_7 : f32 to vector<256x128xf32>
    %10 = arith.maximumf %8, %9 : vector<256x128xf32>
    %11 = arith.truncf %10 : vector<256x128xf32> to vector<256x128xbf16>
    %c0_8 = arith.constant 0 : index
    %c0_9 = arith.constant 0 : index
    %12 = vector.load %arg5[%c0_8, %c0_9] : memref<256x128xbf16, #tpu.memory_space<vmem>>, vector<256x128xbf16>
    tpu.vector_store %arg5[%c0_8, %c0_9], %11 {strides = array<i32>} : memref<256x128xbf16, #tpu.memory_space<vmem>>, vector<256x128xbf16>,
    return
  }
  func.func @transform_0(%arg0: i32) -> (i32, i32) {
    %c0_i32 = arith.constant 0 : i32
    %c0_i32_0 = arith.constant 0 : i32
    return %arg0, %c0_i32 : i32, i32
  }
  func.func @transform_1(%arg0: i32) -> (i32, i32) {
    %c0_i32 = arith.constant 0 : i32
    %c0_i32_0 = arith.constant 0 : i32
    %c0_i32_1 = arith.constant 0 : i32
    return %c0_i32, %c0_i32_0 : i32, i32
  }
  func.func @transform_2(%arg0: i32) -> (i32, i32) {
    %c0_i32 = arith.constant 0 : i32
    %c0_i32_0 = arith.constant 0 : i32
    %c0_i32_1 = arith.constant 0 : i32
    return %c0_i32, %c0_i32_0 : i32, i32
  }
  func.func @transform_3(%arg0: i32) -> (i32, i32) {
    %c0_i32 = arith.constant 0 : i32
    %c0_i32_0 = arith.constant 0 : i32
    %c0_i32_1 = arith.constant 0 : i32
    return %c0_i32, %c0_i32_0 : i32, i32
  }
  func.func @transform_4(%arg0: i32) -> (i32, i32) {
    %c0_i32 = arith.constant 0 : i32
    %c0_i32_0 = arith.constant 0 : i32
    return %arg0, %c0_i32 : i32, i32
  }
}

</mosaic_0001>

<bundles_post_ra>
// kernel: tpu_custom_call.1
= control target key start
LH: loop header
LB: loop body
LE: loop exit
PB: predicated region body
PF: predicated region fallthrough
CT: control target
= control target key end

     0   :  { %9 = vsyncpa [#allocation3], 0  ;;  %s1298_s0 = inlined_call_operand.vmem [shape: bf16[512,27], index: 0, kind: input, shape index: {}]   ;;  %s1299_s1 = inlined_call_operand.vmem [shape: bf16[27,128], index: 1, kind: input, shape index: {}]   ;;  %s1300_s2 = inlined_call_operand.vmem [shape: f32[1,128], index: 2, kind: input, shape index: {}]   ;;  %s1301_s3 = inlined_call_operand.vmem [shape: f32[1,128], index: 3, kind: input, shape index: {}]   ;;  %s1302_s4 = inlined_call_operand.hbm [shape: bf16[512,128], index: 4, kind: output, shape index: {}]  }
   0x1   :  { %11 = vsyncpa [#allocation3 + $0x1], 0  ;;  %s1074_s15 = smov 0   ;;  %s1076_s16 = smov 0  }
   0x2   :  { %s1078_s17 = smov 0   ;;  %s1080_s18 = smov 0  }
   0x3 LB: > { %s1095_s19 = sadd.s32 4294967295, %s1044_s18   ;;  %s718_s20 = sadd.s32 4294967294, %s1044_s18   ;;  %s1044_s18 = sphi %s1080_s18, %s1308_s18   ;;  %s1040_s17 = sphi %s1078_s17, %s1307_s17   ;;  %s1036_s16 = sphi %s1076_s16, %s1306_s16   ;;  %s1032_s15 = sphi %s1074_s15, %s1305_s15  }
   0x4   : > { %s1099_s21 = sadd.s32 1, %s1044_s18   ;;  %s113_s22 = sadd.s32 1, %s1040_s17 }
   0x5   : > { %s110_s23 = ssub.s32 %s1044_s18, %s1099_s21  ;;  %p123_p0 = scmp.ne.s32.totalorder %s1040_s17, %s1036_s16 }
   0x6   : > { %p111_p1 = scmp.eq.s32.totalorder %s110_s23, 0  ;;  %p124_p2 = scmp.eq.s32.totalorder %s1095_s19, 1 }
   0x7   : > { %p129_p3 = scmp.ne.s32.totalorder %s1036_s16, %s1032_s15  ;;  %p130_p4 = scmp.eq.s32.totalorder %s718_s20, 1 }
   0x8   : > { %s1110_s24 = scalar_select %p111_p1, %s1040_s17, %s113_s22  }
   0x9   : > { %p1112_p5 = por %p124_p2, %p123_p0  ;;  %p1116_p6 = por %p130_p4, %p129_p3 }
   0xa   : > { %p721_p7 = scmp.ge.s32.totalorder %s1044_s18, 1  ;;  %p166_p8 = scmp.lt.s32.totalorder %s1044_s18, 3 }
   0xc   : > { %p167_p9 = pnand %p721_p7, %p166_p8 }
   0xd   : > { %s723_s5 = sshll.u32 (!%p167_p9), %s1095_s19, 5  ;;  %s189_s22 = sand.u32 (!%p167_p9), 1, %s1036_s16  }
   0xe   : > { %170 = sbr.rel (%p167_p9) target bundleno = 234 (0xea), region = 36  ;;  %p193_p10 = scmp.lt.s32.totalorder (!%p167_p9), %s723_s5, 63 }
   0xf   : > { %s722_s23 = sshll.u32 (!%p167_p9), %s189_s22, 7  ;;  %s836_s28 = sshll.u32 (!%p167_p9), %s1095_s19, 7 }
  0x10   : > { %s1196_s27 = scalar_lea.vmem (!%p167_p9), [#allocation2], %s722_s23  ;;  %s641_s7 = scalar_lea.sflag (!%p167_p9), [#allocation3], %s189_s22 }
  0x11   : > { %s653_s19 = sshll.u32 (!%p167_p9), %s1196_s27, 4  ;;  %s1002_s12 = scalar_lea.hbm (!%p167_p9), %s1302_s4, 256  ;;  %s654_s19 = int_to_ptr.vmem [resolvable:$true] %s653_s19 }
  0x13   : > { %v795_v0 = vld [vmem:[%s1299_s1 + $0x8] sm:$0xf]  ;;  %v835_v1 = vld [vmem:[%s1299_s1 + $0x8] sm:$0x30]  ;;  %vm376_vm0 = vcmask 1044480   ;;  %vm377_vm1 = vcmask 1045504  }
  0x14   : > { %v796_v2 = vor.u32 %v835_v1, %v795_v0  ;;  %v1046_v3 = vmov 65535   ;;  %s1310_s5 = smov (!%p193_p10, %s723_s5), 63  ;;  %v834_v7 = vld [vmem:[%s1299_s1] sm:$0xff]  ;;  %vm327_vm2 = vcmask 220160  }
  0x15   : > { %v378_v4 = vsel %vm376_vm0, 4294967295, %v1046_v3  ;;  %s724_s8 = sshll.u32 %s1310_s5, 2  ;;  %v1172_v26 = vld [vmem:[%s1300_s2] ss:$0 sm:$0xff]  ;;  %s652_s5 = scalar_lea.hbm %s1302_s4, %s836_s28 }
  0x16   : > { %v379_v5 = vsel %vm377_vm1, %v378_v4, 0  ;;  %s1135_s11 = scalar_lea.vmem %s1298_s0, %s724_s8  ;;  %v1178_v28 = vld [vmem:[%s1301_s3] ss:$0 sm:$0xff]  ;;  %s655_s6 = sshll.u32 %s652_s5, 4  ;;  %s656_s6 = int_to_ptr.hbm [resolvable:$true] %s655_s6 }
  0x17   : > { %v381_v6 = vand.u32 %v796_v2, %v379_v5  ;;  %v818_v8 = vld [vmem:[%s1135_s11] sm:$0xff]  ;;  %v819_v12 = vld [vmem:[%s1135_s11 + $0x8] sm:$0xff]  ;;  %v820_v16 = vld [vmem:[%s1135_s11 + $0x10] sm:$0xff]  ;;  %s996_s8 = sshra.s32 %s656_s6, 4  ;;  %s997_s8 = int_to_ptr.hbm [resolvable:$true] %s996_s8 }
  0x18   : > { %v822_v9 = vld [vmem:[%s1135_s11 + $0x20] sm:$0xff]  ;;  %v823_v13 = vld [vmem:[%s1135_s11 + $0x28] sm:$0xff]  ;;  %v824_v17 = vld [vmem:[%s1135_s11 + $0x30] sm:$0xff]  ;;  %s998_s9 = scalar_lea.hbm %s997_s8, 128  ;;  %p1003_p0 = scmp.lt.s32.totalorder %s997_s8, %s1302_s4 }
  0x19   : > { %389 = vmatpush.bf16.msra.mxu0 %v381_v6  ;;  %932 = vmatpush.bf16.msra.mxu1 %v381_v6  ;;  %v826_v10 = vld [vmem:[%s1135_s11 + $0x40] sm:$0xff]  ;;  %v827_v14 = vld [vmem:[%s1135_s11 + $0x48] sm:$0xff]  ;;  %v828_v18 = vld [vmem:[%s1135_s11 + $0x50] sm:$0xff]  ;;  %p999_p11 = scmp.ne.s32.totalorder %s997_s8, %s998_s9  ;;  %p1004_p1 = scmp.lt.s32.totalorder %s1002_s12, %s998_s9 }
  0x1a   : > { %933 = vmatpush.bf16.msra.mxu2 %v381_v6  ;;  %934 = vmatpush.bf16.msra.mxu3 %v381_v6  ;;  %v830_v11 = vld [vmem:[%s1135_s11 + $0x60] sm:$0xff]  ;;  %v831_v15 = vld [vmem:[%s1135_s11 + $0x68] sm:$0xff]  ;;  %v832_v19 = vld [vmem:[%s1135_s11 + $0x70] sm:$0xff] }
  0x1b   : > { %v821_v20 = vld [vmem:[%s1135_s11 + $0x18] sm:$0xff]  ;;  %p1000_p12 = pnand %p999_p11, %p1112_p5  ;;  %p1005_p2 = por %p1004_p1, %p1003_p0 }
  0x1c   : > { %v825_v21 = vld [vmem:[%s1135_s11 + $0x38] sm:$0xff] }
  0x1d   : > { %390 = vmatpush.bf16.msra.mxu0 %v834_v7  ;;  %935 = vmatpush.bf16.msra.mxu1 %v834_v7  ;;  %v829_v22 = vld [vmem:[%s1135_s11 + $0x58] sm:$0xff]  ;;  %p1001_p13 = pneg %p1000_p12 }
  0x1e   : > { %936 = vmatpush.bf16.msra.mxu2 %v834_v7  ;;  %937 = vmatpush.bf16.msra.mxu3 %v834_v7  ;;  %v833_v23 = vld [vmem:[%s1135_s11 + $0x78] sm:$0xff] }
  0x1f   : > { %p1006_p3 = pnand %p1005_p2, %p1001_p13 }
  0x20   : > { %797 = vmatmul.msk.bf16.vlgmr.msra.gmra.mxu0 %vm327_vm2, %v818_v8  ;;  %801 = vmatmul.msk.bf16.vlgmr.msra.gmra.mxu1 %vm327_vm2, %v822_v9 }
  0x21   : > { %805 = vmatmul.msk.bf16.vlgmr.msra.gmra.mxu2 %vm327_vm2, %v826_v10  ;;  %809 = vmatmul.msk.bf16.vlgmr.msra.gmra.mxu3 %vm327_vm2, %v830_v11 }
  0x30   : > { %798 = vmatmul.msk.bf16.gmra.mxu0 %vm327_vm2, %v819_v12  ;;  %802 = vmatmul.msk.bf16.gmra.mxu1 %vm327_vm2, %v823_v13 }
  0x31   : > { %806 = vmatmul.msk.bf16.gmra.mxu2 %vm327_vm2, %v827_v14  ;;  %810 = vmatmul.msk.bf16.gmra.mxu3 %vm327_vm2, %v831_v15 }
  0x40   : > { %799 = vmatmul.msk.bf16.gmra.mxu0 %vm327_vm2, %v820_v16  ;;  %803 = vmatmul.msk.bf16.gmra.mxu1 %vm327_vm2, %v824_v17 }
  0x41   : > { %807 = vmatmul.msk.bf16.gmra.mxu2 %vm327_vm2, %v828_v18  ;;  %811 = vmatmul.msk.bf16.gmra.mxu3 %vm327_vm2, %v832_v19 }
  0x50   : > { %800 = vmatmul.msk.bf16.gmra.mxu0 %vm327_vm2, %v821_v20  ;;  %804 = vmatmul.msk.bf16.gmra.mxu1 %vm327_vm2, %v825_v21 }
  0x51   : > { %808 = vmatmul.msk.bf16.gmra.mxu2 %vm327_vm2, %v829_v22  ;;  %812 = vmatmul.msk.bf16.gmra.mxu3 %vm327_vm2, %v833_v23 }
  0x9d   : > { %v392_v24 = vpop.f32.mrf.mxu0  ;;  %v412_v25 = vpop.f32.mrf.mxu1 }
  0x9e   : > { %v476_v27 = vmul.f32 %v1172_v26, %v392_v24  ;;  %v484_v29 = vmul.f32 %v1172_v26, %v412_v25 }
  0xa0   : > { %v512_v34 = vadd.f32 %v1178_v28, %v476_v27  ;;  %v520_v35 = vadd.f32 %v1178_v28, %v484_v29 }
  0xa2   : > { %v544_v42 = vmax.f32 %v512_v34, 0.0  ;;  %v552_v43 = vmax.f32 %v520_v35, 0.0 }
  0xa4   : > { %v432_v30 = vpop.f32.mrf.mxu2  ;;  %v452_v31 = vpop.f32.mrf.mxu3 }
  0xa5   : > { %v394_v32 = vpop.f32.mrf.mxu0  ;;  %v414_v33 = vpop.f32.mrf.mxu1  ;;  %v492_v40 = vmul.f32 %v1172_v26, %v432_v30  ;;  %v500_v41 = vmul.f32 %v1172_v26, %v452_v31 }
  0xa6   : > { %v477_v36 = vmul.f32 %v1172_v26, %v394_v32  ;;  %v485_v37 = vmul.f32 %v1172_v26, %v414_v33 }
  0xa7   : > { %v528_v50 = vadd.f32 %v1178_v28, %v492_v40  ;;  %v536_v51 = vadd.f32 %v1178_v28, %v500_v41 }
  0xa8   : > { %v513_v38 = vadd.f32 %v1178_v28, %v477_v36  ;;  %v521_v39 = vadd.f32 %v1178_v28, %v485_v37 }
  0xa9   : > { %v560_v58 = vmax.f32 %v528_v50, 0.0  ;;  %v568_v59 = vmax.f32 %v536_v51, 0.0 }
  0xaa   : > { %v545_v44 = vmax.f32 %v513_v38, 0.0  ;;  %v553_v45 = vmax.f32 %v521_v39, 0.0 }
  0xac   : > { %v840_v46 = vpack.c.bf16 %v545_v44, %v544_v42  ;;  %v860_v47 = vpack.c.bf16 %v553_v45, %v552_v43  ;;  %v434_v48 = vpop.f32.mrf.mxu2  ;;  %v454_v49 = vpop.f32.mrf.mxu3 }
  0xad   : > { %v493_v52 = vmul.f32 %v1172_v26, %v434_v48  ;;  %v501_v53 = vmul.f32 %v1172_v26, %v454_v49  ;;  %v397_v54 = vpop.f32.mrf.mxu0  ;;  %v417_v55 = vpop.f32.mrf.mxu1 }
  0xae   : > { %841 = vst [vmem:[%s1196_s27] sm:$0xff] %v840_v46   ;;  %v478_v62 = vmul.f32 %v1172_v26, %v397_v54  ;;  %v486_v63 = vmul.f32 %v1172_v26, %v417_v55 }
  0xaf   : > { %920 = vst [vmem:[%s1196_s27 + $0x20] sm:$0xff] %v860_v47   ;;  %v529_v56 = vadd.f32 %v1178_v28, %v493_v52  ;;  %v537_v57 = vadd.f32 %v1178_v28, %v501_v53 }
  0xb0   : > { %v514_v6 = vadd.f32 %v1178_v28, %v478_v62  ;;  %v522_v7 = vadd.f32 %v1178_v28, %v486_v63 }
  0xb1   : > { %v561_v60 = vmax.f32 %v529_v56, 0.0  ;;  %v569_v61 = vmax.f32 %v537_v57, 0.0 }
  0xb2   : > { %v546_v14 = vmax.f32 %v514_v6, 0.0  ;;  %v554_v15 = vmax.f32 %v522_v7, 0.0 }
  0xb3   : > { %v880_v0 = vpack.c.bf16 %v561_v60, %v560_v58  ;;  %v900_v1 = vpack.c.bf16 %v569_v61, %v568_v59 }
  0xb4   : > { %v437_v2 = vpop.f32.mrf.mxu2  ;;  %v457_v3 = vpop.f32.mrf.mxu3 }
  0xb5   : > { %924 = vst [vmem:[%s1196_s27 + $0x40] sm:$0xff] %v880_v0   ;;  %v399_v4 = vpop.f32.mrf.mxu0  ;;  %v419_v5 = vpop.f32.mrf.mxu1  ;;  %v494_v12 = vmul.f32 %v1172_v26, %v437_v2  ;;  %v502_v13 = vmul.f32 %v1172_v26, %v457_v3 }
  0xb6   : > { %928 = vst [vmem:[%s1196_s27 + $0x60] sm:$0xff] %v900_v1   ;;  %v479_v8 = vmul.f32 %v1172_v26, %v399_v4  ;;  %v487_v9 = vmul.f32 %v1172_v26, %v419_v5 }
  0xb7   : > { %v530_v22 = vadd.f32 %v1178_v28, %v494_v12  ;;  %v538_v23 = vadd.f32 %v1178_v28, %v502_v13 }
  0xb8   : > { %v515_v10 = vadd.f32 %v1178_v28, %v479_v8  ;;  %v523_v11 = vadd.f32 %v1178_v28, %v487_v9 }
  0xb9   : > { %v562_v32 = vmax.f32 %v530_v22, 0.0  ;;  %v570_v33 = vmax.f32 %v538_v23, 0.0 }
  0xba   : > { %v547_v16 = vmax.f32 %v515_v10, 0.0  ;;  %v555_v17 = vmax.f32 %v523_v11, 0.0 }
  0xbc   : > { %v845_v18 = vpack.c.bf16 %v547_v16, %v546_v14  ;;  %v865_v19 = vpack.c.bf16 %v555_v17, %v554_v15  ;;  %v439_v20 = vpop.f32.mrf.mxu2  ;;  %v459_v21 = vpop.f32.mrf.mxu3 }
  0xbd   : > { %v495_v24 = vmul.f32 %v1172_v26, %v439_v20  ;;  %v503_v25 = vmul.f32 %v1172_v26, %v459_v21  ;;  %v402_v27 = vpop.f32.mrf.mxu0  ;;  %v422_v29 = vpop.f32.mrf.mxu1 }
  0xbe   : > { %917 = vst [vmem:[%s1196_s27 + $0x8] sm:$0xff] %v845_v18   ;;  %v480_v36 = vmul.f32 %v1172_v26, %v402_v27  ;;  %v488_v37 = vmul.f32 %v1172_v26, %v422_v29 }
  0xbf   : > { %921 = vst [vmem:[%s1196_s27 + $0x28] sm:$0xff] %v865_v19   ;;  %v531_v30 = vadd.f32 %v1178_v28, %v495_v24  ;;  %v539_v31 = vadd.f32 %v1178_v28, %v503_v25 }
  0xc0   : > { %v516_v44 = vadd.f32 %v1178_v28, %v480_v36  ;;  %v524_v45 = vadd.f32 %v1178_v28, %v488_v37 }
  0xc1   : > { %v563_v34 = vmax.f32 %v531_v30, 0.0  ;;  %v571_v35 = vmax.f32 %v539_v31, 0.0 }
  0xc2   : > { %v548_v52 = vmax.f32 %v516_v44, 0.0  ;;  %v556_v53 = vmax.f32 %v524_v45, 0.0 }
  0xc3   : > { %v885_v38 = vpack.c.bf16 %v563_v34, %v562_v32  ;;  %v905_v39 = vpack.c.bf16 %v571_v35, %v570_v33 }
  0xc4   : > { %v442_v40 = vpop.f32.mrf.mxu2  ;;  %v462_v41 = vpop.f32.mrf.mxu3 }
  0xc5   : > { %925 = vst [vmem:[%s1196_s27 + $0x48] sm:$0xff] %v885_v38   ;;  %v404_v42 = vpop.f32.mrf.mxu0  ;;  %v424_v43 = vpop.f32.mrf.mxu1  ;;  %v496_v50 = vmul.f32 %v1172_v26, %v442_v40  ;;  %v504_v51 = vmul.f32 %v1172_v26, %v462_v41 }
  0xc6   : > { %929 = vst [vmem:[%s1196_s27 + $0x68] sm:$0xff] %v905_v39   ;;  %v481_v46 = vmul.f32 %v1172_v26, %v404_v42  ;;  %v489_v47 = vmul.f32 %v1172_v26, %v424_v43 }
  0xc7   : > { %v532_v60 = vadd.f32 %v1178_v28, %v496_v50  ;;  %v540_v61 = vadd.f32 %v1178_v28, %v504_v51 }
  0xc8   : > { %v517_v48 = vadd.f32 %v1178_v28, %v481_v46  ;;  %v525_v49 = vadd.f32 %v1178_v28, %v489_v47 }
  0xc9   : > { %v564_v4 = vmax.f32 %v532_v60, 0.0  ;;  %v572_v5 = vmax.f32 %v540_v61, 0.0 }
  0xca   : > { %v549_v54 = vmax.f32 %v517_v48, 0.0  ;;  %v557_v55 = vmax.f32 %v525_v49, 0.0 }
  0xcc   : > { %v850_v56 = vpack.c.bf16 %v549_v54, %v548_v52  ;;  %v870_v57 = vpack.c.bf16 %v557_v55, %v556_v53  ;;  %v444_v58 = vpop.f32.mrf.mxu2  ;;  %v464_v59 = vpop.f32.mrf.mxu3 }
  0xcd   : > { %v497_v62 = vmul.f32 %v1172_v26, %v444_v58  ;;  %v505_v63 = vmul.f32 %v1172_v26, %v464_v59  ;;  %v407_v0 = vpop.f32.mrf.mxu0  ;;  %v427_v1 = vpop.f32.mrf.mxu1 }
  0xce   : > { %918 = vst [vmem:[%s1196_s27 + $0x10] sm:$0xff] %v850_v56   ;;  %v482_v8 = vmul.f32 %v1172_v26, %v407_v0  ;;  %v490_v9 = vmul.f32 %v1172_v26, %v427_v1 }
  0xcf   : > { %922 = vst [vmem:[%s1196_s27 + $0x30] sm:$0xff] %v870_v57   ;;  %v533_v2 = vadd.f32 %v1178_v28, %v497_v62  ;;  %v541_v3 = vadd.f32 %v1178_v28, %v505_v63 }
  0xd0   : > { %v518_v16 = vadd.f32 %v1178_v28, %v482_v8  ;;  %v526_v17 = vadd.f32 %v1178_v28, %v490_v9 }
  0xd1   : > { %v565_v6 = vmax.f32 %v533_v2, 0.0  ;;  %v573_v7 = vmax.f32 %v541_v3, 0.0 }
  0xd2   : > { %v550_v24 = vmax.f32 %v518_v16, 0.0  ;;  %v558_v25 = vmax.f32 %v526_v17, 0.0 }
  0xd3   : > { %v890_v10 = vpack.c.bf16 %v565_v6, %v564_v4  ;;  %v910_v11 = vpack.c.bf16 %v573_v7, %v572_v5 }
  0xd4   : > { %v447_v12 = vpop.f32.mrf.mxu2  ;;  %v467_v13 = vpop.f32.mrf.mxu3 }
  0xd5   : > { %926 = vst [vmem:[%s1196_s27 + $0x50] sm:$0xff] %v890_v10   ;;  %v409_v14 = vpop.f32.mrf.mxu0  ;;  %v429_v15 = vpop.f32.mrf.mxu1  ;;  %v498_v22 = vmul.f32 %v1172_v26, %v447_v12  ;;  %v506_v23 = vmul.f32 %v1172_v26, %v467_v13 }
  0xd6   : > { %930 = vst [vmem:[%s1196_s27 + $0x70] sm:$0xff] %v910_v11   ;;  %v483_v18 = vmul.f32 %v1172_v26, %v409_v14  ;;  %v491_v19 = vmul.f32 %v1172_v26, %v429_v15 }
  0xd7   : > { %v534_v34 = vadd.f32 %v1178_v28, %v498_v22  ;;  %v542_v35 = vadd.f32 %v1178_v28, %v506_v23 }
  0xd8   : > { %v519_v20 = vadd.f32 %v1178_v28, %v483_v18  ;;  %v527_v21 = vadd.f32 %v1178_v28, %v491_v19 }
  0xd9   : > { %v566_v40 = vmax.f32 %v534_v34, 0.0  ;;  %v574_v41 = vmax.f32 %v542_v35, 0.0 }
  0xda   : > { %v551_v27 = vmax.f32 %v519_v20, 0.0  ;;  %v559_v29 = vmax.f32 %v527_v21, 0.0 }
  0xdc   : > { %v855_v30 = vpack.c.bf16 %v551_v27, %v550_v24  ;;  %v875_v31 = vpack.c.bf16 %v559_v29, %v558_v25  ;;  %v449_v32 = vpop.f32.mrf.mxu2  ;;  %v469_v33 = vpop.f32.mrf.mxu3 }
  0xdd   : > { %v499_v36 = vmul.f32 %v1172_v26, %v449_v32  ;;  %v507_v37 = vmul.f32 %v1172_v26, %v469_v33 }
  0xde   : > { %919 = vst [vmem:[%s1196_s27 + $0x18] sm:$0xff] %v855_v30  }
  0xdf   : > { %923 = vst [vmem:[%s1196_s27 + $0x38] sm:$0xff] %v875_v31   ;;  %v535_v38 = vadd.f32 %v1178_v28, %v499_v36  ;;  %v543_v39 = vadd.f32 %v1178_v28, %v507_v37 }
  0xe1   : > { %v567_v42 = vmax.f32 %v535_v38, 0.0  ;;  %v575_v26 = vmax.f32 %v543_v39, 0.0 }
  0xe3   : > { %v895_v43 = vpack.c.bf16 %v567_v42, %v566_v40  ;;  %v915_v44 = vpack.c.bf16 %v575_v26, %v574_v41 }
  0xe5   : > { %927 = vst [vmem:[%s1196_s27 + $0x58] sm:$0xff] %v895_v43  }
  0xe6   : > { %931 = vst [vmem:[%s1196_s27 + $0x78] sm:$0xff] %v915_v44  }
  0xe7   : > { %1009 = shalt.err (!%p1006_p3)
}
  0xe8   : > { %s1047_s20 = smov 64   ;;  %s1048_s22 = smov 4  }
  0xe9   : > { %938 = dma.vmem_to_hbm [thread:$0]  (%p1112_p5), %s654_s19, 2048, %s656_s6, %s641_s7, %s1047_s20, %s1047_s20, %s1048_s22  }
  0xea PF: > { %p944_p4 = scmp.ge.s32.totalorder %s1044_s18, 2  ;;  %s670_s23 = sand.u32 1, %s1032_s15  }
  0xeb   : > { %s671_s27 = scalar_lea.sflag [#allocation3], %s670_s23 }
  0xec   : > { %p941_p7 = pnand %p944_p4, %p1116_p6 }
  0xee   : > { %p942_p8 = pneg %p941_p7 }
  0xf0   : > { %1027 = dma.done.wait (%p942_p8), %s671_s27, 2048  }
  0xf1   : > { %1029 = vsyncadd (%p942_p8), %s671_s27, 4294965248  ;;  %p14_p9 = scmp.ge.s32.totalorder %s1099_s21, 4   ;;  %s1305_s15 = smov %s1036_s16 }
  0xf2   : > { %s1306_s16 = smov %s1040_s17  ;;  %s1307_s17 = smov %s1110_s24 }
  0xf3   : > { %s1308_s18 = smov %s1099_s21  ;;  %16 = sbr.rel (!%p14_p9) target bundleno = 3 (0x3), region = 71 }
  0xf8   :  { %677 = vsyncpa [#allocation3], 1 }
  0xf9   :  { %679 = vsyncpa [#allocation3 + $0x1], 1 }

</bundles_post_ra>
